<compile_context>
chip_gen: v7x
topology: tpu7x:2x2x1
jax: 0.10.0
libtpu: 0.0.40
codegen_flags: <defaults>
</compile_context>

<pallas_src>
import functools

import jax
import jax.numpy as jnp
import numpy as np
from jax.experimental import pallas as pl
from jax.experimental.pallas import tpu as pltpu

_LANES = 128
_SUBLANES = 8
_MAX_BLOCK_ROWS = 8192        # 8192 x 128 x 4B = 4 MiB f32 per input per buffer
_MAX_BLOCK_ROWS_HARD = 16384  # never exceed 8 MiB/buffer -> 32 MiB double-buffered (v7x safe)


def _loss_partial_kernel(p_ref, t_ref, out_ref, *, loss_fn, total_rows, block_rows):
    """Writes the partial sum of one (block_rows, 128) tile as an aligned (8, 128) tile."""
    d = p_ref[...].astype(jnp.float32) - t_ref[...].astype(jnp.float32)
    v = jnp.abs(d) if loss_fn == "l1" else d * d

    def reduce_tile(x):
        # Fold rows onto an (8, 128) tile.  Use 4 independent accumulator chains when
        # block_rows allows, so the serial vadd chain stays short enough to hide under
        # the per-block DMA even on v7x (~3.2 TB/s HBM).
        if block_rows >= 32 and block_rows % 32 == 0:
            x4 = x.reshape(block_rows // 32, 4, _SUBLANES, _LANES)
            return x4.sum(axis=0).sum(axis=0)
        return x.reshape(block_rows // _SUBLANES, _SUBLANES, _LANES).sum(axis=0)

    if total_rows % block_rows != 0:
        # Ragged tail: only the last block pays the iota/compare/select.  Its rows past
        # total_rows are undefined, so select 0.0 there (jnp.where is NaN/Inf-safe).
        i = pl.program_id(0)
        last = pl.num_programs(0) - 1

        @pl.when(i != last)
        def _():
            out_ref[0] = reduce_tile(v)

        @pl.when(i == last)
        def _():
            row = jax.lax.broadcasted_iota(jnp.int32, v.shape, 0)
            vm = jnp.where(i * block_rows + row < total_rows, v, 0.0)
            out_ref[0] = reduce_tile(vm)
    else:
        out_ref[0] = reduce_tile(v)


def multi_representation_loss(preds, targets, *, loss_fn="l1",
                              max_block_rows=_MAX_BLOCK_ROWS):
    """Matches nn.L1Loss()/nn.MSELoss() default 'mean' reduction -> scalar []."""
    if loss_fn not in ("l1", "l2"):
        raise ValueError(f"Unsupported loss function name: {loss_fn}")
    assert preds.shape == targets.shape

    n_elems = int(np.prod(preds.shape))
    flat_p = preds.reshape(-1)
    flat_t = targets.reshape(-1)

    # Realistic frame tensors (2 * frame_size^2 a multiple of 8*128) skip this branch,
    # so the common path adds zero extra HBM traffic.
    sub_block = _SUBLANES * _LANES
    n_pad = (-n_elems) % sub_block
    if n_pad:
        # TODO(synk): rare odd-size fallback copies both inputs once; padded zeros add 0 to both losses.
        flat_p = jnp.pad(flat_p, (0, n_pad))
        flat_t = jnp.pad(flat_t, (0, n_pad))

    rows = (n_elems + n_pad) // _LANES  # always a multiple of 8
    p2 = flat_p.reshape(rows, _LANES)
    t2 = flat_t.reshape(rows, _LANES)

    hint = min(_MAX_BLOCK_ROWS_HARD,
               max(_SUBLANES, (int(max_block_rows) // _SUBLANES) * _SUBLANES))
    block_rows = min(rows, hint)
    # Megacore: on large inputs keep >= 4 blocks so the "parallel" grid axis shards the
    # streaming across both v7x TensorCores (harmless on 1-TC v5e/v6e).
    if rows >= 4 * 512 and rows // block_rows < 4:
        block_rows = min(block_rows, max(512, ((rows // 4) // 32) * 32))
    num_blocks = -(-rows // block_rows)

    # 2 inputs x 2 pipeline buffers x block, plus slack for the tiny output buffers.
    block_bytes = block_rows * _LANES * 4
    vmem_limit_bytes = int(min(48 << 20, max(16 << 20, 4 * block_bytes + (4 << 20))))

    cost = pl.CostEstimate(
        flops=3 * n_elems,
        transcendentals=0,
        bytes_accessed=8 * (n_elems + n_pad) + 4 * num_blocks * _SUBLANES * _LANES,
    )

    partials = pl.pallas_call(
        functools.partial(
            _loss_partial_kernel,
            loss_fn=loss_fn,
            total_rows=rows,
            block_rows=block_rows,
        ),
        out_shape=jax.ShapeDtypeStruct((num_blocks, _SUBLANES, _LANES), jnp.float32),
        grid=(num_blocks,),
        in_specs=[
            pl.BlockSpec((block_rows, _LANES), lambda i: (i, 0)),
            pl.BlockSpec((block_rows, _LANES), lambda i: (i, 0)),
        ],
        out_specs=pl.BlockSpec((1, _SUBLANES, _LANES), lambda i: (i, 0, 0)),
        compiler_params=pltpu.CompilerParams(
            dimension_semantics=("parallel",),  # disjoint aligned partial tiles -> 2-TC safe
            vmem_limit_bytes=vmem_limit_bytes,
        ),
        cost_estimate=cost,
    )(p2, t2)

    # Final cross-block / cross-lane reduce in f32 (tiny), divide by the true count.
    return jnp.sum(partials) / jnp.float32(n_elems)


if __name__ == "__main__":
    # Shapes consistent with the module docstring: [batch, n_targets, 2, frame, frame].
    B, NT, C, F = 2, 4, 2, 16
    key = jax.random.PRNGKey(0)
    kp, kt = jax.random.split(key)
    preds = jax.random.normal(kp, (B, NT, C, F, F), dtype=jnp.float32)
    targets = jax.random.normal(kt, (B, NT, C, F, F), dtype=jnp.float32)

    # Odd element count (not a multiple of 8*128) exercises the tiny-pad fallback.
    preds_odd = jax.random.normal(kp, (1, 3, 2, 9, 9), dtype=jnp.float32)
    targets_odd = jax.random.normal(kt, (1, 3, 2, 9, 9), dtype=jnp.float32)

    # Larger input (rows = 2304) exercises the >=4-block megacore split + 4-way reduce.
    preds_big = jax.random.normal(kp, (4, 4, 2, 96, 96), dtype=jnp.float32)
    targets_big = jax.random.normal(kt, (4, 4, 2, 96, 96), dtype=jnp.float32)

    def ref_loss(a, b, name):
        a64 = np.asarray(a, dtype=np.float64)
        b64 = np.asarray(b, dtype=np.float64)
        return np.mean(np.abs(a64 - b64)) if name == "l1" else np.mean((a64 - b64) ** 2)

    ok = True
    for name in ("l1", "l2"):
        # 1) default block (single aligned block at this size)
        loss = jax.block_until_ready(
            multi_representation_loss(preds, targets, loss_fn=name))
        ok &= bool(np.allclose(np.asarray(loss), ref_loss(preds, targets, name),
                               rtol=1e-5, atol=1e-6))

        # 2) small blocks -> multi-step parallel grid with a masked partial last block
        loss = jax.block_until_ready(
            multi_representation_loss(preds, targets, loss_fn=name, max_block_rows=24))
        ok &= bool(np.allclose(np.asarray(loss), ref_loss(preds, targets, name),
                               rtol=1e-5, atol=1e-6))

        # 3) element count not a multiple of 8*128 -> pad fallback
        loss = jax.block_until_ready(
            multi_representation_loss(preds_odd, targets_odd, loss_fn=name))
        ok &= bool(np.allclose(np.asarray(loss), ref_loss(preds_odd, targets_odd, name),
                               rtol=1e-5, atol=1e-6))

        # 4) larger input, default block hint -> 4-block grid, 4-way accumulators
        loss = jax.block_until_ready(
            multi_representation_loss(preds_big, targets_big, loss_fn=name))
        ok &= bool(np.allclose(np.asarray(loss), ref_loss(preds_big, targets_big, name),
                               rtol=1e-4, atol=1e-6))

    if ok:
        print("KERNEL_OK")
</pallas_src>

<mosaic_0001>
module attributes {stable_mosaic.version = 11 : i64} {
  func.func @_loss_partial_kernel(%arg0: i32, %arg1: memref<32x128xf32, #tpu.memory_space<vmem>>, %arg2: memref<32x128xf32, #tpu.memory_space<vmem>>, %arg3: memref<1x8x128xf32, #tpu.memory_space<vmem>>) attributes {dimension_semantics = [#tpu.dimension_semantics<parallel>], iteration_bounds = array<i64: 1>, scalar_prefetch = 0 : i64, scratch_operands = 0 : i64, tpu.core_type = #tpu.core_type<tc>, window_params = [{transform_indices = @transform_0, window_bounds = array<i64: 32, 128>}, {transform_indices = @transform_1, window_bounds = array<i64: 32, 128>}, {transform_indices = @transform_2, window_bounds = array<i64: 1, 8, 128>}]} {
    %c0 = arith.constant 0 : index
    %c0_0 = arith.constant 0 : index
    %0 = vector.load %arg1[%c0, %c0_0] : memref<32x128xf32, #tpu.memory_space<vmem>>, vector<32x128xf32>
    %c0_1 = arith.constant 0 : index
    %c0_2 = arith.constant 0 : index
    %1 = vector.load %arg2[%c0_1, %c0_2] : memref<32x128xf32, #tpu.memory_space<vmem>>, vector<32x128xf32>
    %2 = arith.subf %0, %1 : vector<32x128xf32>
    %3 = math.absf %2 : vector<32x128xf32>
    %4 = vector.shape_cast %3 : vector<32x128xf32> to vector<1x4x8x128xf32>
    %cst = arith.constant dense<0.000000e+00> : vector<4x8x128xf32>
    %5 = vector.multi_reduction <add>, %4, %cst [0] : vector<1x4x8x128xf32> to vector<4x8x128xf32>
    %cst_3 = arith.constant dense<0.000000e+00> : vector<8x128xf32>
    %6 = vector.multi_reduction <add>, %5, %cst_3 [0] : vector<4x8x128xf32> to vector<8x128xf32>
    %c0_4 = arith.constant 0 : index
    %c0_5 = arith.constant 0 : index
    %c0_6 = arith.constant 0 : index
    %7 = vector.load %arg3[%c0_4, %c0_5, %c0_6] : memref<1x8x128xf32, #tpu.memory_space<vmem>>, vector<1x8x128xf32>
    %8 = vector.shape_cast %7 : vector<1x8x128xf32> to vector<8x128xf32>
    %9 = vector.shape_cast %6 : vector<8x128xf32> to vector<1x8x128xf32>
    tpu.vector_store %arg3[%c0_4, %c0_5, %c0_6], %9 {strides = array<i32>} : memref<1x8x128xf32, #tpu.memory_space<vmem>>, vector<1x8x128xf32>,
    return
  }
  func.func @transform_0(%arg0: i32) -> (i32, i32) {
    %c0_i32 = arith.constant 0 : i32
    %c0_i32_0 = arith.constant 0 : i32
    return %arg0, %c0_i32 : i32, i32
  }
  func.func @transform_1(%arg0: i32) -> (i32, i32) {
    %c0_i32 = arith.constant 0 : i32
    %c0_i32_0 = arith.constant 0 : i32
    return %arg0, %c0_i32 : i32, i32
  }
  func.func @transform_2(%arg0: i32) -> (i32, i32, i32) {
    %c0_i32 = arith.constant 0 : i32
    %c0_i32_0 = arith.constant 0 : i32
    %c0_i32_1 = arith.constant 0 : i32
    return %arg0, %c0_i32, %c0_i32_0 : i32, i32, i32
  }
}

</mosaic_0001>

<bundles_post_ra>
// kernel: tpu_custom_call.1
= control target key start
LH: loop header
LB: loop body
LE: loop exit
PB: predicated region body
PF: predicated region fallthrough
CT: control target
= control target key end

     0   :  { %7 = vsyncpa [#allocation3], 0  ;;  %s213_s0 = inlined_call_operand.hbm [shape: f32[32,128], index: 0, kind: input, shape index: {}]   ;;  %s214_s1 = inlined_call_operand.hbm [shape: f32[32,128], index: 1, kind: input, shape index: {}]   ;;  %s215_s2 = inlined_call_operand.hbm [shape: f32[1,8,128], index: 2, kind: output, shape index: {}]  }
   0x1   :  { %8 = vsyncpa [#allocation6], 0 }
   0x2   :  { %9 = vsyncpa [#allocation4], 0  ;;  %s157_s9 = smov [#allocation2]   ;;  %s85_s13 = scalar_lea.hbm %s213_s0, 512 }
   0x3   :  { %s15_s10 = sshll.u32 %s157_s9, 4  ;;  %p86_p0 = scmp.ne.s32.totalorder %s213_s0, %s85_s13  ;;  %s16_s10 = int_to_ptr.vmem [resolvable:$true] %s15_s10 }
   0x4   :  { %p89_p1 = scmp.lt.u32.totalorder %s85_s13, %s213_s0 }
   0x6   :  { %p91_p2 = pnand %p89_p1, %p86_p0 }
   0x8   :  { %94 = shalt.err (!%p91_p2)
}
   0x9   :  { %s95_s18 = scalar_lea.vmem %s16_s10, 512  ;;  %p100_p4 = scmp.lt.s32.totalorder %s16_s10, %s16_s10 }
   0xa   :  { %p96_p3 = scmp.ne.s32.totalorder %s16_s10, %s95_s18  ;;  %p101_p5 = scmp.lt.s32.totalorder %s95_s18, %s95_s18 }
   0xc   :  { %p102_p6 = por %p101_p5, %p100_p4 }
   0xe   :  { %p103_p7 = pnand %p102_p6, %p96_p3 }
  0x10   :  { %106 = shalt.err (!%p103_p7)
}
  0x11   :  { %s158_s19 = smov 128   ;;  %s159_s20 = smov 8  }
  0x12   :  { %21 = dma.hbm_to_vmem [thread:$0]  %s213_s0, 512, %s16_s10, [#allocation3], %s158_s19, %s158_s19, %s159_s20  }
  0x13   :  { %s160_s23 = smov [#allocation5]   ;;  %s107_s27 = scalar_lea.hbm %s214_s1, 512 }
  0x14   :  { %s27_s24 = sshll.u32 %s160_s23, 4  ;;  %p108_p8 = scmp.ne.s32.totalorder %s214_s1, %s107_s27  ;;  %s28_s24 = int_to_ptr.vmem [resolvable:$true] %s27_s24 }
  0x15   :  { %p111_p9 = scmp.lt.u32.totalorder %s107_s27, %s214_s1 }
  0x17   :  { %p113_p10 = pnand %p111_p9, %p108_p8 }
  0x19   :  { %116 = shalt.err (!%p113_p10)
}
  0x1a   :  { %s117_s4 = scalar_lea.vmem %s28_s24, 512  ;;  %p122_p12 = scmp.lt.s32.totalorder %s28_s24, %s28_s24 }
  0x1b   :  { %p118_p11 = scmp.ne.s32.totalorder %s28_s24, %s117_s4  ;;  %p123_p13 = scmp.lt.s32.totalorder %s117_s4, %s117_s4 }
  0x1d   :  { %p124_p0 = por %p123_p13, %p122_p12 }
  0x1f   :  { %p125_p1 = pnand %p124_p0, %p118_p11 }
  0x21   :  { %128 = shalt.err (!%p125_p1)
}
  0x22   :  { %33 = dma.hbm_to_vmem [thread:$0]  %s214_s1, 512, %s28_s24, [#allocation6], %s158_s19, %s158_s19, %s159_s20  }
  0x23   :  { %151 = dma.done.wait [#allocation3], 512  }
  0x24   :  { %152 = vsyncadd [#allocation3], 4294966784 }
  0x25   :  { %153 = dma.done.wait [#allocation6], 512  }
  0x26   :  { %154 = vsyncadd [#allocation6], 4294966784  ;;  %v40_v0 = vld [vmem:[#allocation2] sm:$0xff]  ;;  %v41_v1 = vld [vmem:[#allocation2 + $0x8] sm:$0xff]  ;;  %s161_s1 = smov [#allocation7]  }
  0x27   :  { %v42_v2 = vld [vmem:[#allocation2 + $0x10] sm:$0xff]  ;;  %v43_v3 = vld [vmem:[#allocation2 + $0x18] sm:$0xff]  ;;  %v44_v4 = vld [vmem:[#allocation5] sm:$0xff]  ;;  %s70_s6 = sshll.u32 %s161_s1, 4  ;;  %s71_s6 = int_to_ptr.vmem [resolvable:$true] %s70_s6 }
  0x28   :  { %v45_v5 = vld [vmem:[#allocation5 + $0x8] sm:$0xff]  ;;  %v46_v6 = vld [vmem:[#allocation5 + $0x10] sm:$0xff]  ;;  %v47_v7 = vld [vmem:[#allocation5 + $0x18] sm:$0xff]  ;;  %v48_v8 = vsub.f32 %v40_v0, %v44_v4  ;;  %s129_s7 = scalar_lea.vmem %s71_s6, 128  ;;  %p134_p3 = scmp.lt.s32.totalorder %s71_s6, %s71_s6 }
  0x29   :  { %v49_v9 = vsub.f32 %v41_v1, %v45_v5  ;;  %v50_v10 = vsub.f32 %v42_v2, %v46_v6  ;;  %v51_v11 = vsub.f32 %v43_v3, %v47_v7  ;;  %p130_p2 = scmp.ne.s32.totalorder %s71_s6, %s129_s7  ;;  %p135_p4 = scmp.lt.s32.totalorder %s129_s7, %s129_s7 }
  0x2a   :  { %v52_v12 = vand.u32 2147483647, %v48_v8 }
  0x2b   :  { %v53_v13 = vand.u32 2147483647, %v49_v9  ;;  %v54_v14 = vand.u32 2147483647, %v50_v10  ;;  %v55_v15 = vand.u32 2147483647, %v51_v11  ;;  %p136_p5 = por %p135_p4, %p134_p3 }
  0x2d   :  { %v60_v16 = vadd.f32 %v53_v13, %v52_v12  ;;  %p137_p6 = pnand %p136_p5, %p130_p2 }
  0x2f   :  { %v61_v17 = vadd.f32 %v60_v16, %v54_v14 }
  0x31   :  { %v62_v18 = vadd.f32 %v61_v17, %v55_v15 }
  0x33   :  { %63 = vst [vmem:[#allocation7] sm:$0xff] %v62_v18 }
  0x34   :  { %140 = shalt.err (!%p137_p6)
}
  0x35   :  { %s141_s10 = scalar_lea.hbm %s215_s2, 128 }
  0x36   :  { %p142_p7 = scmp.ne.s32.totalorder %s215_s2, %s141_s10  ;;  %p145_p8 = scmp.lt.u32.totalorder %s141_s10, %s215_s2 }
  0x38   :  { %p147_p9 = pnand %p145_p8, %p142_p7 }
  0x3a   :  { %150 = shalt.err (!%p147_p9)
}
  0x3b   :  { %73 = dma.vmem_to_hbm [thread:$0]  %s71_s6, 128, %s215_s2, [#allocation4]  }
  0x3c   :  { %155 = dma.done.wait [#allocation4], 128  }
  0x3d   :  { %156 = vsyncadd [#allocation4], 4294967168 }
  0x3e   :  { %77 = vsyncpa [#allocation3], 1 }
  0x3f   :  { %78 = vsyncpa [#allocation6], 1 }
  0x40   :  { %79 = vsyncpa [#allocation4], 1 }

</bundles_post_ra>
